<compile_context>
chip_gen: v6e
topology: v6e:2x2x1
jax: 0.10.0
libtpu: 0.0.40
codegen_flags: <defaults>
</compile_context>

<pallas_src>
import functools
import math

import jax
import jax.numpy as jnp
from jax.experimental import pallas as pl
from jax.experimental.pallas import tpu as pltpu

LN_EPS = 1e-5                       # PyTorch LayerNorm default eps
VMEM_LIMIT = 48 * 1024 * 1024       # fits v5e/v6e (128 MiB) and v7x (64 MiB)


def _tile(dim, target):
    """Pick the largest legal tile <= target that evenly divides dim."""
    if dim <= target:
        return dim
    for cand in (target, 512, 256, 128, 64, 32, 16, 8):
        if cand <= target and dim % cand == 0:
            return cand
    return dim


# ---------------------------------------------------------------------------
# Kernel 1: tiled matmul + bias  (used for q / kv projections and out Linear)
# ---------------------------------------------------------------------------
def _matmul_bias_kernel(x_ref, w_ref, b_ref, o_ref, acc_ref):
    @pl.when(pl.program_id(2) == 0)
    def _init():
        acc_ref[...] = jnp.zeros_like(acc_ref)

    acc_ref[...] += jnp.dot(x_ref[...], w_ref[...],
                            preferred_element_type=jnp.float32)

    @pl.when(pl.program_id(2) == pl.num_programs(2) - 1)
    def _finalize():
        o_ref[...] = (acc_ref[...] + b_ref[...]).astype(o_ref.dtype)


def linear_pallas(x, w, b, out_dtype=jnp.bfloat16, *, tm=256, tn=256, tk=512):
    """x: [M, K] @ w: [K, N] + b: [N] -> [M, N] (bf16 matmul, f32 accumulate)."""
    x = x.astype(jnp.bfloat16)
    w = w.astype(jnp.bfloat16)
    b = b.astype(jnp.float32).reshape(1, -1)
    M, K = x.shape
    N = w.shape[1]
    bm, bn, bk = _tile(M, tm), _tile(N, tn), _tile(K, tk)
    grid = (M // bm, N // bn, K // bk)
    flops = 2 * M * N * K
    bytes_accessed = 2 * (M * K + K * N) + 4 * N + M * N * jnp.dtype(out_dtype).itemsize
    return pl.pallas_call(
        _matmul_bias_kernel,
        out_shape=jax.ShapeDtypeStruct((M, N), out_dtype),
        grid_spec=pltpu.PrefetchScalarGridSpec(
            num_scalar_prefetch=0,
            grid=grid,
            in_specs=[
                pl.BlockSpec((bm, bk), lambda i, j, k: (i, k)),
                pl.BlockSpec((bk, bn), lambda i, j, k: (k, j)),
                pl.BlockSpec((1, bn), lambda i, j, k: (0, j)),
            ],
            out_specs=pl.BlockSpec((bm, bn), lambda i, j, k: (i, j)),
            scratch_shapes=[pltpu.VMEM((bm, bn), jnp.float32)],
        ),
        compiler_params=pltpu.CompilerParams(
            dimension_semantics=("parallel", "parallel", "arbitrary"),
            vmem_limit_bytes=VMEM_LIMIT),
        cost_estimate=pl.CostEstimate(flops=int(flops), transcendentals=0,
                                      bytes_accessed=int(bytes_accessed)),
    )(x, w, b)


# ---------------------------------------------------------------------------
# Kernel 2: multi-head attention, one batch element per grid step.
# q: [B, Lq, D], kv: [B, Lk, 2D] (fused K|V) -> [B, Lq, D].  Head split is
# done in-register so loads/stores stay lane-dense on D.
# ---------------------------------------------------------------------------
def _mha_kernel(q_ref, kv_ref, o_ref, *, nhead, scale):
    D = q_ref.shape[-1]
    Dh = D // nhead
    q = q_ref[0]            # [Lq, D]  bf16
    kv = kv_ref[0]          # [Lk, 2D] bf16
    k = kv[:, :D]
    v = kv[:, D:]
    outs = []
    for h in range(nhead):  # static unroll over heads
        sl = slice(h * Dh, (h + 1) * Dh)
        qh, kh, vh = q[:, sl], k[:, sl], v[:, sl]
        # q @ k^T without materializing a transpose (contract Dh of both).
        s = jax.lax.dot_general(qh, kh, (((1,), (1,)), ((), ())),
                                preferred_element_type=jnp.float32) * scale
        s = s - jnp.max(s, axis=-1, keepdims=True)
        p = jnp.exp(s)
        p = p * pl.reciprocal(jnp.sum(p, axis=-1, keepdims=True), approx=True)
        outs.append(jnp.dot(p.astype(vh.dtype), vh,
                            preferred_element_type=jnp.float32))
    o_ref[0] = jnp.concatenate(outs, axis=-1).astype(o_ref.dtype)


def attention_pallas(q, kv, nhead, scale):
    # TODO(synk): full [Lq, Lk] scores per head are held in VMEM (no flash-style
    # KV tiling) and no causal tgt_mask path is implemented (mask=None only).
    B, Lq, D = q.shape
    Lk = kv.shape[1]
    flops = 4 * B * Lq * Lk * D
    bytes_accessed = 2 * (B * Lq * D + B * Lk * 2 * D + B * Lq * D)
    return pl.pallas_call(
        functools.partial(_mha_kernel, nhead=nhead, scale=scale),
        out_shape=jax.ShapeDtypeStruct((B, Lq, D), jnp.bfloat16),
        grid_spec=pltpu.PrefetchScalarGridSpec(
            num_scalar_prefetch=0,
            grid=(B,),
            in_specs=[
                pl.BlockSpec((1, Lq, D), lambda b: (b, 0, 0)),
                pl.BlockSpec((1, Lk, 2 * D), lambda b: (b, 0, 0)),
            ],
            out_specs=pl.BlockSpec((1, Lq, D), lambda b: (b, 0, 0)),
        ),
        compiler_params=pltpu.CompilerParams(
            dimension_semantics=("parallel",),
            vmem_limit_bytes=VMEM_LIMIT),
        cost_estimate=pl.CostEstimate(flops=int(flops),
                                      transcendentals=int(B * nhead * Lq * Lk),
                                      bytes_accessed=int(bytes_accessed)),
    )(q.astype(jnp.bfloat16), kv.astype(jnp.bfloat16))


# ---------------------------------------------------------------------------
# Kernel 3: fused (attention output projection + residual + LayerNorm)
# ---------------------------------------------------------------------------
def _proj_residual_ln_kernel(a_ref, w_ref, b_ref, r_ref, g_ref, bt_ref, o_ref):
    y = jnp.dot(a_ref[...], w_ref[...],
                preferred_element_type=jnp.float32) + b_ref[...]
    y = y + r_ref[...].astype(jnp.float32)
    mu = jnp.mean(y, axis=-1, keepdims=True)
    var = jnp.mean(jnp.square(y - mu), axis=-1, keepdims=True)
    o_ref[...] = ((y - mu) * jax.lax.rsqrt(var + LN_EPS) * g_ref[...]
                  + bt_ref[...]).astype(o_ref.dtype)


def proj_residual_ln_pallas(a, w, b, resid, g, beta, *, tm=256):
    """LayerNorm(resid + a @ w + b); a, resid: [M, D], w: [D, D]."""
    M, K = a.shape
    N = w.shape[1]
    bm = _tile(M, tm)
    a = a.astype(jnp.bfloat16)
    w = w.astype(jnp.bfloat16)
    resid = resid.astype(jnp.bfloat16)
    b = b.astype(jnp.float32).reshape(1, N)
    g = g.astype(jnp.float32).reshape(1, N)
    beta = beta.astype(jnp.float32).reshape(1, N)
    flops = 2 * M * K * N + 10 * M * N
    bytes_accessed = 2 * (M * K + K * N + 2 * M * N) + 12 * N
    return pl.pallas_call(
        _proj_residual_ln_kernel,
        out_shape=jax.ShapeDtypeStruct((M, N), jnp.bfloat16),
        grid_spec=pltpu.PrefetchScalarGridSpec(
            num_scalar_prefetch=0,
            grid=(M // bm,),
            in_specs=[
                pl.BlockSpec((bm, K), lambda i: (i, 0)),
                pl.BlockSpec((K, N), lambda i: (0, 0)),
                pl.BlockSpec((1, N), lambda i: (0, 0)),
                pl.BlockSpec((bm, N), lambda i: (i, 0)),
                pl.BlockSpec((1, N), lambda i: (0, 0)),
                pl.BlockSpec((1, N), lambda i: (0, 0)),
            ],
            out_specs=pl.BlockSpec((bm, N), lambda i: (i, 0)),
        ),
        compiler_params=pltpu.CompilerParams(
            dimension_semantics=("parallel",),
            vmem_limit_bytes=VMEM_LIMIT),
        cost_estimate=pl.CostEstimate(flops=int(flops), transcendentals=0,
                                      bytes_accessed=int(bytes_accessed)),
    )(a, w, b, resid, g, beta)


# ---------------------------------------------------------------------------
# Kernel 4: fused (FFN + residual + LayerNorm), FF tiled as a reduction axis
# with a f32 VMEM accumulator (keeps VMEM use bounded on v7x).
# ---------------------------------------------------------------------------
def _ffn_residual_ln_kernel(x_ref, w1_ref, b1_ref, w2_ref, b2_ref, g_ref,
                            bt_ref, o_ref, acc_ref):
    f = pl.program_id(1)

    @pl.when(f == 0)
    def _init():
        acc_ref[...] = jnp.zeros_like(acc_ref)

    h = jnp.dot(x_ref[...], w1_ref[...],
                preferred_element_type=jnp.float32) + b1_ref[...]
    h = jnp.maximum(h, 0.0).astype(x_ref.dtype)   # ReLU (decoder-layer default)
    acc_ref[...] += jnp.dot(h, w2_ref[...], preferred_element_type=jnp.float32)

    @pl.when(f == pl.num_programs(1) - 1)
    def _finalize():
        y = acc_ref[...] + b2_ref[...] + x_ref[...].astype(jnp.float32)
        mu = jnp.mean(y, axis=-1, keepdims=True)
        var = jnp.mean(jnp.square(y - mu), axis=-1, keepdims=True)
        o_ref[...] = ((y - mu) * jax.lax.rsqrt(var + LN_EPS) * g_ref[...]
                      + bt_ref[...]).astype(o_ref.dtype)


def ffn_residual_ln_pallas(x, w1, b1, w2, b2, g, beta, *, tm=256, tff=512):
    """LayerNorm(x + relu(x @ w1 + b1) @ w2 + b2); x: [M, D]."""
    M, D = x.shape
    FF = w1.shape[1]
    bm, bff = _tile(M, tm), _tile(FF, tff)
    x = x.astype(jnp.bfloat16)
    w1 = w1.astype(jnp.bfloat16)
    w2 = w2.astype(jnp.bfloat16)
    b1 = b1.astype(jnp.float32).reshape(1, FF)
    b2 = b2.astype(jnp.float32).reshape(1, D)
    g = g.astype(jnp.float32).reshape(1, D)
    beta = beta.astype(jnp.float32).reshape(1, D)
    flops = 4 * M * D * FF
    bytes_accessed = 2 * (2 * M * D + 2 * D * FF) + 4 * (FF + 3 * D)
    return pl.pallas_call(
        _ffn_residual_ln_kernel,
        out_shape=jax.ShapeDtypeStruct((M, D), jnp.bfloat16),
        grid_spec=pltpu.PrefetchScalarGridSpec(
            num_scalar_prefetch=0,
            grid=(M // bm, FF // bff),
            in_specs=[
                pl.BlockSpec((bm, D), lambda i, f: (i, 0)),
                pl.BlockSpec((D, bff), lambda i, f: (0, f)),
                pl.BlockSpec((1, bff), lambda i, f: (0, f)),
                pl.BlockSpec((bff, D), lambda i, f: (f, 0)),
                pl.BlockSpec((1, D), lambda i, f: (0, 0)),
                pl.BlockSpec((1, D), lambda i, f: (0, 0)),
                pl.BlockSpec((1, D), lambda i, f: (0, 0)),
            ],
            out_specs=pl.BlockSpec((bm, D), lambda i, f: (i, 0)),
            scratch_shapes=[pltpu.VMEM((bm, D), jnp.float32)],
        ),
        compiler_params=pltpu.CompilerParams(
            dimension_semantics=("parallel", "arbitrary"),
            vmem_limit_bytes=VMEM_LIMIT),
        cost_estimate=pl.CostEstimate(flops=int(flops), transcendentals=0,
                                      bytes_accessed=int(bytes_accessed)),
    )(x, w1, b1, w2, b2, g, beta)


# ---------------------------------------------------------------------------
# Pure-JAX reference ops (identical bf16 casting points; validate the kernels)
# ---------------------------------------------------------------------------
def linear_ref(x, w, b, out_dtype=jnp.bfloat16):
    y = jnp.dot(x.astype(jnp.bfloat16), w.astype(jnp.bfloat16),
                preferred_element_type=jnp.float32) + b.astype(jnp.float32)
    return y.astype(out_dtype)


def attention_ref(q, kv, nhead, scale):
    q = q.astype(jnp.bfloat16)
    kv = kv.astype(jnp.bfloat16)
    B, Lq, D = q.shape
    Lk = kv.shape[1]
    Dh = D // nhead
    k = kv[..., :D].reshape(B, Lk, nhead, Dh)
    v = kv[..., D:].reshape(B, Lk, nhead, Dh)
    qh = q.reshape(B, Lq, nhead, Dh)
    s = jnp.einsum("bqhd,bkhd->bhqk", qh, k,
                   preferred_element_type=jnp.float32) * scale
    p = jax.nn.softmax(s, axis=-1)
    o = jnp.einsum("bhqk,bkhd->bqhd", p.astype(jnp.bfloat16), v,
                   preferred_element_type=jnp.float32)
    return o.reshape(B, Lq, D).astype(jnp.bfloat16)


def proj_residual_ln_ref(a, w, b, resid, g, beta):
    y = jnp.dot(a.astype(jnp.bfloat16), w.astype(jnp.bfloat16),
                preferred_element_type=jnp.float32) + b.astype(jnp.float32)
    y = y + resid.astype(jnp.bfloat16).astype(jnp.float32)
    mu = jnp.mean(y, axis=-1, keepdims=True)
    var = jnp.mean(jnp.square(y - mu), axis=-1, keepdims=True)
    return ((y - mu) * jax.lax.rsqrt(var + LN_EPS) * g + beta).astype(jnp.bfloat16)


def ffn_residual_ln_ref(x, w1, b1, w2, b2, g, beta):
    xb = x.astype(jnp.bfloat16)
    h = jnp.dot(xb, w1.astype(jnp.bfloat16),
                preferred_element_type=jnp.float32) + b1.astype(jnp.float32)
    h = jnp.maximum(h, 0.0).astype(jnp.bfloat16)
    y = jnp.dot(h, w2.astype(jnp.bfloat16),
                preferred_element_type=jnp.float32) + b2.astype(jnp.float32)
    y = y + xb.astype(jnp.float32)
    mu = jnp.mean(y, axis=-1, keepdims=True)
    var = jnp.mean(jnp.square(y - mu), axis=-1, keepdims=True)
    return ((y - mu) * jax.lax.rsqrt(var + LN_EPS) * g + beta).astype(jnp.bfloat16)


PALLAS_OPS = dict(linear=linear_pallas, attention=attention_pallas,
                  proj_ln=proj_residual_ln_pallas, ffn_ln=ffn_residual_ln_pallas)
REF_OPS = dict(linear=linear_ref, attention=attention_ref,
               proj_ln=proj_residual_ln_ref, ffn_ln=ffn_residual_ln_ref)


# ---------------------------------------------------------------------------
# Model glue
# ---------------------------------------------------------------------------
def _embed_tokens(in_w, in_b, token_ids, state_ids, state_size):
    """Equivalent of the two-hot scatter + input Linear via two row gathers.

    Flat index of (v, s) in the [V*S] one-hot is v*S + s, so the scatter puts
    ones at token*S (state slot 0) and at state (token slot 0).  When
    token==0 AND state==0 both scatters hit index 0 which is set to 1 once,
    so the gather-sum double-count is subtracted back out.
    """
    S = state_size
    tok_rows = jnp.take(in_w, token_ids * S, axis=0)      # [B, T, D]
    st_rows = jnp.take(in_w, state_ids, axis=0)           # [B, T, D]
    emb = tok_rows + st_rows + in_b[None, None, :]
    both0 = (token_ids == 0) & (state_ids == 0)
    return emb - jnp.where(both0[..., None], in_w[0][None, None, :], 0.0)


def _mha_block(h, x_kv, layer, pre, ln_pre, nhead, ops):
    B, Lq, D = h.shape
    Lk = x_kv.shape[1]
    q = ops["linear"](h.reshape(B * Lq, D), layer[pre + "wq"], layer[pre + "bq"])
    kv = ops["linear"](x_kv.reshape(B * Lk, D), layer[pre + "wkv"],
                       layer[pre + "bkv"])
    attn = ops["attention"](q.reshape(B, Lq, D), kv.reshape(B, Lk, 2 * D),
                            nhead, 1.0 / math.sqrt(D // nhead))
    out = ops["proj_ln"](attn.reshape(B * Lq, D), layer[pre + "wo"],
                         layer[pre + "bo"], h.reshape(B * Lq, D),
                         layer[ln_pre + "g"], layer[ln_pre + "b"])
    return out.reshape(B, Lq, D)


def reflective_core_forward(params, token_ids, state_ids, prefix, *,
                            vocab_size, state_size, nhead, ops=PALLAS_OPS):
    # TODO(synk): optional causal tgt_mask path not implemented (mask=None only);
    # dropout layers are identity (eval mode).
    B, T = token_ids.shape
    V, S = vocab_size, state_size
    in_w, in_b = params["in_w"], params["in_b"]
    D = in_w.shape[1]

    emb = _embed_tokens(in_w, in_b, token_ids, state_ids, S)         # [B, T, D]
    x = jnp.concatenate([prefix.astype(jnp.float32), emb], axis=1)   # [B, L, D]
    L = x.shape[1]
    h = (x + params["pos"][:L][None, :, :]).astype(jnp.bfloat16)
    memory = h   # decoder(x, x): cross-attention memory is the layer-0 input.

    for layer in params["layers"]:
        h = _mha_block(h, h, layer, "sa_", "ln1_", nhead, ops)        # self-attn
        h = _mha_block(h, memory, layer, "ca_", "ln2_", nhead, ops)   # cross-attn
        h = ops["ffn_ln"](h.reshape(B * L, D),
                          layer["ffn_w1"], layer["ffn_b1"],
                          layer["ffn_w2"], layer["ffn_b2"],
                          layer["ln3_g"], layer["ln3_b"]).reshape(B, L, D)

    logits = ops["linear"](h.reshape(B * L, D), params["out_w"],
                           params["out_b"], out_dtype=jnp.float32)
    return logits.reshape(B, L, V, S)


# ---------------------------------------------------------------------------
# Deterministic parameter construction (synthetic; weights stored as [in, out])
# ---------------------------------------------------------------------------
def init_params(key, vocab_size, state_size, d_model, dim_ff, num_layers, max_pos):
    V, S, D, FF = vocab_size, state_size, d_model, dim_ff
    keys = iter(jax.random.split(key, 5 + num_layers * 16))

    def nrm(shape, scale=0.02):
        return jax.random.normal(next(keys), shape, jnp.float32) * scale

    params = {
        "in_w": nrm((V * S, D)),
        "in_b": nrm((D,)),
        "out_w": nrm((D, V * S)),
        "out_b": nrm((V * S,)),
        "pos": nrm((max_pos, D)),
        "layers": [],
    }
    for _ in range(num_layers):
        layer = {}
        for pre in ("sa_", "ca_"):     # self-attn and cross-attn blocks
            layer[pre + "wq"] = nrm((D, D))
            layer[pre + "bq"] = nrm((D,))
            layer[pre + "wkv"] = nrm((D, 2 * D))     # fused K|V projection
            layer[pre + "bkv"] = nrm((2 * D,))
            layer[pre + "wo"] = nrm((D, D))
            layer[pre + "bo"] = nrm((D,))
        layer["ffn_w1"] = nrm((D, FF))
        layer["ffn_b1"] = nrm((FF,))
        layer["ffn_w2"] = nrm((FF, D))
        layer["ffn_b2"] = nrm((D,))
        for i in (1, 2, 3):
            layer[f"ln{i}_g"] = jnp.ones((D,), jnp.float32)
            layer[f"ln{i}_b"] = jnp.zeros((D,), jnp.float32)
        params["layers"].append(layer)
    return params


if __name__ == "__main__":
    # Small, forward-consistent configuration.
    vocab_size, state_size = 8, 4
    d_model, nhead, dim_ff, num_layers = 32, 4, 64, 2
    max_seq_len = 64
    B, T, C = 2, 8, 4  # batch, token sequence length, prefix length

    key = jax.random.PRNGKey(0)
    k_par, k_tok, k_st, k_pre = jax.random.split(key, 4)
    params = init_params(k_par, vocab_size, state_size, d_model, dim_ff,
                         num_layers, max_seq_len + 512)
    token_ids = jax.random.randint(k_tok, (B, T), 0, vocab_size)
    state_ids = jax.random.randint(k_st, (B, T), 0, state_size)
    prefix = jax.random.normal(k_pre, (B, C, d_model), jnp.float32) * 0.02

    # Sanity-check the gather-based embedding against the dense two-hot scatter.
    V, S = vocab_size, state_size
    xd = jnp.zeros((B, T, V, S), jnp.float32)
    bi = jnp.arange(B)[:, None]
    ti = jnp.arange(T)[None, :]
    xd = xd.at[bi, ti, token_ids, 0].set(1.0)
    xd = xd.at[bi, ti, 0, state_ids].set(1.0)
    dense = jnp.einsum("btk,kd->btd", xd.reshape(B, T, V * S), params["in_w"],
                       precision=jax.lax.Precision.HIGHEST) + params["in_b"]
    gath = _embed_tokens(params["in_w"], params["in_b"], token_ids, state_ids, S)
    assert float(jnp.max(jnp.abs(dense - gath))) < 1e-5

    fwd = functools.partial(reflective_core_forward, vocab_size=vocab_size,
                            state_size=state_size, nhead=nhead)

    out = jax.block_until_ready(
        fwd(params, token_ids, state_ids, prefix, ops=PALLAS_OPS))

    assert out.shape == (B, C + T, vocab_size, state_size), out.shape
    assert bool(jnp.all(jnp.isfinite(out)))

    ref = jax.block_until_ready(
        fwd(params, token_ids, state_ids, prefix, ops=REF_OPS))
    err = float(jnp.max(jnp.abs(out - ref)))
    assert err < 1e-2, err

    print("KERNEL_OK")
</pallas_src>

<mosaic_0001>
module attributes {stable_mosaic.version = 11 : i64} {
  func.func @_matmul_bias_kernel(%arg0: i32, %arg1: i32, %arg2: i32, %arg3: memref<24x32xbf16, #tpu.memory_space<vmem>>, %arg4: memref<32x32xbf16, #tpu.memory_space<vmem>>, %arg5: memref<1x32xf32, #tpu.memory_space<vmem>>, %arg6: memref<24x32xbf16, #tpu.memory_space<vmem>>, %arg7: memref<24x32xf32, #tpu.memory_space<vmem>>) attributes {dimension_semantics = [#tpu.dimension_semantics<parallel>, #tpu.dimension_semantics<parallel>, #tpu.dimension_semantics<arbitrary>], iteration_bounds = array<i64: 1, 1, 1>, scalar_prefetch = 0 : i64, scratch_operands = 1 : i64, tpu.core_type = #tpu.core_type<tc>, window_params = [{transform_indices = @transform_0, window_bounds = array<i64: 24, 32>}, {transform_indices = @transform_1, window_bounds = array<i64: 32, 32>}, {transform_indices = @transform_2, window_bounds = array<i64: 1, 32>}, {transform_indices = @transform_3, window_bounds = array<i64: 24, 32>}]} {
    %c0_i32 = arith.constant 0 : i32
    %0 = arith.cmpi eq, %arg2, %c0_i32 : i32
    %1 = arith.extui %0 : i1 to i32
    %c0_i32_0 = arith.constant 0 : i32
    %2 = arith.cmpi ne, %1, %c0_i32_0 : i32
    scf.if %2 {
      %cst_10 = arith.constant 0.000000e+00 : f32
      %12 = vector.broadcast %cst_10 : f32 to vector<24x32xf32>
      %c0_11 = arith.constant 0 : index
      %c0_12 = arith.constant 0 : index
      %13 = vector.load %arg7[%c0_11, %c0_12] : memref<24x32xf32, #tpu.memory_space<vmem>>, vector<24x32xf32>
      tpu.vector_store %arg7[%c0_11, %c0_12], %12 {strides = array<i32>} : memref<24x32xf32, #tpu.memory_space<vmem>>, vector<24x32xf32>,
    } else {
    }
    %c0 = arith.constant 0 : index
    %c0_1 = arith.constant 0 : index
    %3 = vector.load %arg7[%c0, %c0_1] : memref<24x32xf32, #tpu.memory_space<vmem>>, vector<24x32xf32>
    %c0_2 = arith.constant 0 : index
    %c0_3 = arith.constant 0 : index
    %4 = vector.load %arg3[%c0_2, %c0_3] : memref<24x32xbf16, #tpu.memory_space<vmem>>, vector<24x32xbf16>
    %c0_4 = arith.constant 0 : index
    %c0_5 = arith.constant 0 : index
    %5 = vector.load %arg4[%c0_4, %c0_5] : memref<32x32xbf16, #tpu.memory_space<vmem>>, vector<32x32xbf16>
    %cst = arith.constant dense<0.000000e+00> : vector<24x32xf32>
    %6 = tpu.matmul %4, %5, %cst {dimension_numbers = #tpu.dot_dimension_numbers<[1], [0], [0], [1], [0, 0, 1, 1], [], []>} : vector<24x32xbf16>, vector<32x32xbf16>, vector<24x32xf32> -> vector<24x32xf32>
    %7 = arith.addf %3, %6 : vector<24x32xf32>
    %c0_6 = arith.constant 0 : index
    %c0_7 = arith.constant 0 : index
    %8 = vector.load %arg7[%c0_6, %c0_7] : memref<24x32xf32, #tpu.memory_space<vmem>>, vector<24x32xf32>
    tpu.vector_store %arg7[%c0_6, %c0_7], %7 {strides = array<i32>} : memref<24x32xf32, #tpu.memory_space<vmem>>, vector<24x32xf32>,
    %c0_i32_8 = arith.constant 0 : i32
    %9 = arith.cmpi eq, %arg2, %c0_i32_8 : i32
    %10 = arith.extui %9 : i1 to i32
    %c0_i32_9 = arith.constant 0 : i32
    %11 = arith.cmpi ne, %10, %c0_i32_9 : i32
    scf.if %11 {
      %c0_10 = arith.constant 0 : index
      %c0_11 = arith.constant 0 : index
      %12 = vector.load %arg7[%c0_10, %c0_11] : memref<24x32xf32, #tpu.memory_space<vmem>>, vector<24x32xf32>
      %c0_12 = arith.constant 0 : index
      %c0_13 = arith.constant 0 : index
      %13 = vector.load %arg5[%c0_12, %c0_13] : memref<1x32xf32, #tpu.memory_space<vmem>>, vector<1x32xf32>
      %14 = vector.broadcast %13 : vector<1x32xf32> to vector<24x32xf32>
      %15 = arith.addf %12, %14 : vector<24x32xf32>
      %16 = arith.truncf %15 : vector<24x32xf32> to vector<24x32xbf16>
      %c0_14 = arith.constant 0 : index
      %c0_15 = arith.constant 0 : index
      %17 = vector.load %arg6[%c0_14, %c0_15] : memref<24x32xbf16, #tpu.memory_space<vmem>>, vector<24x32xbf16>
      tpu.vector_store %arg6[%c0_14, %c0_15], %16 {strides = array<i32>} : memref<24x32xbf16, #tpu.memory_space<vmem>>, vector<24x32xbf16>,
    } else {
    }
    return
  }
  func.func @transform_0(%arg0: i32, %arg1: i32, %arg2: i32) -> (i32, i32) {
    %c0_i32 = arith.constant 0 : i32
    return %arg0, %arg2 : i32, i32
  }
  func.func @transform_1(%arg0: i32, %arg1: i32, %arg2: i32) -> (i32, i32) {
    %c0_i32 = arith.constant 0 : i32
    return %arg2, %arg1 : i32, i32
  }
  func.func @transform_2(%arg0: i32, %arg1: i32, %arg2: i32) -> (i32, i32) {
    %c0_i32 = arith.constant 0 : i32
    %c0_i32_0 = arith.constant 0 : i32
    return %c0_i32, %arg1 : i32, i32
  }
  func.func @transform_3(%arg0: i32, %arg1: i32, %arg2: i32) -> (i32, i32) {
    %c0_i32 = arith.constant 0 : i32
    return %arg0, %arg1 : i32, i32
  }
}

</mosaic_0001>

<bundles_post_ra>
// kernel: tpu_custom_call.1
= control target key start
LH: loop header
LB: loop body
LE: loop exit
PB: predicated region body
PF: predicated region fallthrough
CT: control target
= control target key end

     0   :  { %8 = vsyncpa [#allocation4], 0  ;;  %s350_s0 = inlined_call_operand.hbm [shape: bf16[24,32], index: 0, kind: input, shape index: {}]   ;;  %s351_s1 = inlined_call_operand.hbm [shape: bf16[32,32], index: 1, kind: input, shape index: {}]   ;;  %s352_s2 = inlined_call_operand.vmem [shape: f32[1,32], index: 2, kind: input, shape index: {}]   ;;  %s353_s3 = inlined_call_operand.hbm [shape: bf16[24,32], index: 3, kind: output, shape index: {}]  }
   0x1   :  { %9 = vsyncpa [#allocation7], 0 }
   0x2   :  { %10 = vsyncpa [#allocation5], 0  ;;  %s295_s12 = smov [#allocation3]  }
   0x3   :  { %s16_s13 = sshll.u32 %s295_s12, 4  ;;  %s17_s13 = int_to_ptr.vmem [resolvable:$true] %s16_s13 }
   0x4   :  { %s237_s14 = scalar_lea.vmem %s17_s13, 192  ;;  %p242_p1 = scmp.lt.s32.totalorder %s17_s13, %s17_s13 }
   0x5   :  { %p238_p0 = scmp.ne.s32.totalorder %s17_s13, %s237_s14  ;;  %p243_p2 = scmp.lt.s32.totalorder %s237_s14, %s237_s14 }
   0x7   :  { %p244_p3 = por %p243_p2, %p242_p1 }
   0x9   :  { %p245_p4 = pnand %p244_p3, %p238_p0 }
   0xb   :  { %248 = shalt.err (!%p245_p4)
}
   0xc   :  { %s296_s15 = smov 64   ;;  %s297_s16 = smov 4  }
   0xd   :  { %22 = dma.hbm_to_vmem [thread:$0]  %s350_s0, 192, %s17_s13, [#allocation4], %s296_s15, %s296_s15, %s297_s16  }
   0xe   :  { %s298_s19 = smov [#allocation6]  }
   0xf   :  { %s28_s20 = sshll.u32 %s298_s19, 4  ;;  %s29_s20 = int_to_ptr.vmem [resolvable:$true] %s28_s20 }
  0x10   :  { %s257_s21 = scalar_lea.vmem %s29_s20, 256  ;;  %p262_p6 = scmp.lt.s32.totalorder %s29_s20, %s29_s20 }
  0x11   :  { %p258_p5 = scmp.ne.s32.totalorder %s29_s20, %s257_s21  ;;  %p263_p7 = scmp.lt.s32.totalorder %s257_s21, %s257_s21 }
  0x13   :  { %p264_p8 = por %p263_p7, %p262_p6 }
  0x15   :  { %p265_p9 = pnand %p264_p8, %p258_p5 }
  0x17   :  { %268 = shalt.err (!%p265_p9)
}
  0x18   :  { %34 = dma.hbm_to_vmem [thread:$0]  %s351_s1, 256, %s29_s20, [#allocation7], %s296_s15, %s296_s15, %s297_s16  }
  0x19   :  { %289 = dma.done.wait [#allocation4], 192  }
  0x1a   :  { %290 = vsyncadd [#allocation4], 4294967104 }
  0x1b   :  { %291 = dma.done.wait [#allocation7], 256  }
  0x1c   :  { %292 = vsyncadd [#allocation7], 4294967040  ;;  %vm48_vm0 = vcmask 261120   ;;  %v299_v0 = vmov 0.0   ;;  %v225_v1 = vld [vmem:[#allocation6 + $0x8] sm:$0xff]   ;;  %v226_v2 = vld [vmem:[#allocation6] sm:$0xff]  }
  0x1d   :  { %51 = vst.msk [vmem:[#allocation2 + $0x10] sm:$0xff] %vm48_vm0, %v299_v0  ;;  %49 = vst.msk [vmem:[#allocation2] sm:$0xff] %vm48_vm0, %v299_v0  ;;  %211 = vmatprep.subr.bf16.mxu0 %v225_v1  ;;  %v227_v3 = vld [vmem:[#allocation3] sm:$0xff]   ;;  %v228_v4 = vld [vmem:[#allocation3 + $0x8] ss:$0 sps:$4 sm:$0xff]   ;;  %vm172_vm1 = vcmask 257024  }
  0x1e   :  { %50 = vst.msk [vmem:[#allocation2 + $0x8] sm:$0xff] %vm48_vm0, %v299_v0  ;;  %212 = vmatpush3.bf16.msra.mxu0 %v225_v1  ;;  %215 = vmatprep.mubr.msk.bf16.mxu0 %vm48_vm0, %v227_v3  ;;  %v200_v15 = vld [vmem:[%s352_s2] ss:$0 sm:$0xff]  ;;  %s300_s24 = smov [#allocation8]  }
  0x1f   :  { %213 = vmatprep.subr.bf16.mxu0 %v226_v2  ;;  %s181_s25 = sshll.u32 %s300_s24, 4  ;;  %s182_s25 = int_to_ptr.vmem [resolvable:$true] %s181_s25 }
  0x20   :  { %s269_s26 = scalar_lea.vmem %s182_s25, 192  ;;  %p274_p11 = scmp.lt.s32.totalorder %s182_s25, %s182_s25 }
  0x21   :  { %p270_p10 = scmp.ne.s32.totalorder %s182_s25, %s269_s26  ;;  %p275_p12 = scmp.lt.s32.totalorder %s269_s26, %s269_s26 }
  0x22   :  { %214 = vmatpush3.bf16.msra.mxu0 %v226_v2 }
  0x23   :  { %p276_p13 = por %p275_p12, %p274_p11 }
  0x24   :  { %v54_v5 = vld [vmem:[#allocation2 + $0x10] sm:$0xff]  ;;  %v52_v7 = vld [vmem:[#allocation2] sm:$0xff] }
  0x25   :  { %216 = vmatmul.mubr.msk.bf16.vlgmr.msra.gmra.mxu0 %vm48_vm0, %v228_v4  ;;  %v53_v12 = vld [vmem:[#allocation2 + $0x8] sm:$0xff]  ;;  %p277_p0 = pnand %p276_p13, %p270_p10 }
  0xe5   :  { %v217_v6 = vpop.f32.mrf.mxu0 }
  0xe6   :  { %v139_v8 = vadd.f32 %v217_v6, %v54_v5 }
  0xe7   :  { %v123_v9 = vpop.f32.mrf.mxu0 }
  0xe8   :  { %142 = vst.msk [vmem:[#allocation2 + $0x10] sm:$0xff] %vm48_vm0, %v139_v8  ;;  %v137_v10 = vadd.f32 %v123_v9, %v52_v7 }
  0xe9   :  { %v218_v11 = vpop.f32.mrf.mxu0 }
  0xea   :  { %140 = vst.msk [vmem:[#allocation2] sm:$0xff] %vm48_vm0, %v137_v10 }
  0xeb   :  { %v126_v13 = vpop.f32.mrf.mxu0 }
  0xec   :  { %v138_v14 = vadd.f32 %v126_v13, %v53_v12 }
  0xee   :  { %141 = vst.msk [vmem:[#allocation2 + $0x8] sm:$0xff] %vm48_vm0, %v138_v14 }
  0xef   :  { %v148_v16 = vld [vmem:[#allocation2 + $0x10] sm:$0xff] }
  0xf0   :  { %v158_v17 = vadd.f32 %v200_v15, %v148_v16 }
  0xf1   :  { %v146_v18 = vld [vmem:[#allocation2] sm:$0xff] }
  0xf2   :  { %v156_v19 = vadd.f32 %v200_v15, %v146_v18  ;;  %v206_v20 = vpack.c.bf16 %v158_v17, %v158_v17 }
  0xf4   :  { %v204_v21 = vpack.c.bf16 %v156_v19, %v156_v19  ;;  %175 = vst.msk [vmem:[#allocation8 + $0x8] sm:$0xf] %vm172_vm1, %v206_v20 }
  0xf5   :  { %v147_v22 = vld [vmem:[#allocation2 + $0x8] sm:$0xff] }
  0xf6   :  { %v157_v23 = vadd.f32 %v200_v15, %v147_v22  ;;  %173 = vst.msk [vmem:[#allocation8] sm:$0xf] %vm172_vm1, %v204_v21 }
  0xf8   :  { %v205_v24 = vpack.c.bf16 %v157_v23, %v157_v23 }
  0xfa   :  { %174 = vst.msk [vmem:[#allocation8 + $0x4] sm:$0xf] %vm172_vm1, %v205_v24 }
  0xfb   :  { %280 = shalt.err (!%p277_p0)
}
  0xfc   :  { %187 = dma.vmem_to_hbm [thread:$0]  %s182_s25, 192, %s353_s3, [#allocation5], %s296_s15, %s296_s15, %s297_s16  }
  0xfd   :  { %293 = dma.done.wait [#allocation5], 192  }
  0xfe   :  { %294 = vsyncadd [#allocation5], 4294967104 }
  0xff   :  { %191 = vsyncpa [#allocation4], 1 }
 0x100   :  { %192 = vsyncpa [#allocation7], 1 }
 0x101   :  { %193 = vsyncpa [#allocation5], 1 }

</bundles_post_ra>
